<compile_context>
chip_gen: v6e
topology: v6e:2x2x1
jax: 0.10.0
libtpu: 0.0.40
codegen_flags: <defaults>
</compile_context>

<pallas_src>
import jax
import jax.numpy as jnp
from jax.experimental import pallas as pl
from jax.experimental.pallas import tpu as pltpu


# ----------------------------------------------------------------------------
# Fused kernel: im2col-GEMM (conv) + bias + ReLU -> global sum pool
#               -> Linear (pool scale pre-folded into fc weight).
# ----------------------------------------------------------------------------
def make_fused_kernel(matmul_dtype):
    def kernel(p_ref, w_ref, cb_ref, fw_ref, fb_ref, o_ref):
        # p_ref : (Bt, HW, Kp)   lane-dense im2col patches (K zero-padded to 128)
        # w_ref : (Kp, CoutP)    flattened 3x3 conv weights, zero-padded
        # cb_ref: (1, CoutP)     conv bias (f32), zero-padded
        # fw_ref: (CoutP, NCP)   fc weight^T * 1/(H*W), zero-padded lane-dense
        # fb_ref: (1, NCP)       fc bias, zero-padded
        # o_ref : (1, Bt, NCP)   lane-dense logits slab (unmasked vst)
        Bt, HW, Kp = p_ref.shape
        CoutP = w_ref.shape[1]

        # Merge leading dims only -- layout-free, no lane repack.
        p = p_ref[...].reshape(Bt * HW, Kp)

        # Single MXU GEMM for the whole batch tile: (Bt*HW, Kp) x (Kp, CoutP).
        acc = jnp.dot(p, w_ref[...], preferred_element_type=jnp.float32)
        acc = jnp.maximum(acc + cb_ref[...], 0.0)              # bias + ReLU, f32

        # AdaptiveAvgPool2d((1,1)): per-image sum; the 1/(H*W) scale is folded
        # into fw in the wrapper.  Split of leading dim is layout-free.
        pooled = acc.reshape(Bt, HW, CoutP).sum(axis=1)        # (Bt, CoutP) f32

        logits = jnp.dot(pooled.astype(matmul_dtype), fw_ref[...],
                         preferred_element_type=jnp.float32) + fb_ref[...]
        o_ref[...] = logits.reshape(o_ref.shape)

    return kernel


# ----------------------------------------------------------------------------
# Full forward (NCHW in, logits out) mirroring NewClassificationModel.forward
# ----------------------------------------------------------------------------
def new_classification_model_forward(x_nchw, conv_w, conv_b, fc_w, fc_b,
                                     matmul_dtype=jnp.float32, max_bt=8):
    N, Cin, H, W = x_nchw.shape
    Cout = conv_w.shape[-1]                 # org_classes (feature channels)
    num_classes = fc_w.shape[0]             # PyTorch Linear weight: (nc, Cout)
    HW = H * W

    # Lane-dense (>=128, multiple of 128) padded GEMM dims.
    Kp = max(128, pl.cdiv(9 * Cin, 128) * 128)
    CoutP = max(128, pl.cdiv(Cout, 128) * 128)
    NCP = max(128, pl.cdiv(num_classes, 128) * 128)

    # Batch tiling: amortize per-step overhead, but keep >= 2 grid steps so
    # both v7x TensorCores get work (no cost on single-TC v5e/v6e).
    Bt = 1 if N < 2 else min(pl.cdiv(N, 2), max_bt)
    steps = pl.cdiv(N, Bt)
    N_pad = steps * Bt

    # --- wrapper-side im2col (XLA) into a lane-dense, zero-padded slab -------
    x_nhwc = jnp.transpose(x_nchw, (0, 2, 3, 1))                # NCHW -> NHWC
    x_sp = jnp.pad(x_nhwc, ((0, 0), (1, 1), (1, 1), (0, 0)))    # spatial pad 1
    # Tap-major (dy, dx, c) ordering, matching conv_w.reshape(9*Cin, Cout).
    cols = [x_sp[:, dy:dy + H, dx:dx + W, :]
            for dy in range(3) for dx in range(3)]
    patches = jnp.concatenate(cols, axis=-1).reshape(N, HW, 9 * Cin)
    patches = jnp.pad(patches, ((0, N_pad - N), (0, 0), (0, Kp - 9 * Cin)))
    patches = patches.astype(matmul_dtype)

    # Flattened, zero-padded conv weights / bias.
    w_flat = conv_w.reshape(9 * Cin, Cout)
    w_flat = jnp.pad(w_flat,
                     ((0, Kp - 9 * Cin), (0, CoutP - Cout))).astype(matmul_dtype)
    cb = jnp.pad(conv_b.reshape(1, Cout),
                 ((0, 0), (0, CoutP - Cout))).astype(jnp.float32)

    # fc weight transposed, pre-scaled by the pooling factor, zero-padded.
    fw = fc_w.T * (1.0 / HW)
    fw = jnp.pad(fw, ((0, CoutP - Cout),
                      (0, NCP - num_classes))).astype(matmul_dtype)
    fb = jnp.pad(fc_b.reshape(1, num_classes),
                 ((0, 0), (0, NCP - num_classes))).astype(jnp.float32)

    out = pl.pallas_call(
        make_fused_kernel(matmul_dtype),
        out_shape=jax.ShapeDtypeStruct((steps, Bt, NCP), jnp.float32),
        grid_spec=pltpu.PrefetchScalarGridSpec(
            num_scalar_prefetch=0,
            grid=(steps,),
            in_specs=[
                pl.BlockSpec((Bt, HW, Kp), lambda i: (i, 0, 0)),
                pl.BlockSpec((Kp, CoutP), lambda i: (0, 0)),
                pl.BlockSpec((1, CoutP), lambda i: (0, 0)),
                pl.BlockSpec((CoutP, NCP), lambda i: (0, 0)),
                pl.BlockSpec((1, NCP), lambda i: (0, 0)),
            ],
            out_specs=pl.BlockSpec((1, Bt, NCP), lambda i: (i, 0, 0)),
        ),
        compiler_params=pltpu.CompilerParams(
            dimension_semantics=("parallel",)),
    )(patches, w_flat, cb, fw, fb)

    # Padded batch rows / padded class lanes are sliced away here.
    return out.reshape(N_pad, NCP)[:N, :num_classes]


def _reference(x_nchw, conv_w, conv_b, fc_w, fc_b):
    # pure-JAX reference for correctness check
    x_nhwc = jnp.transpose(x_nchw, (0, 2, 3, 1))
    feats = jax.lax.conv_general_dilated(
        x_nhwc, conv_w, window_strides=(1, 1), padding="SAME",
        dimension_numbers=("NHWC", "HWIO", "NHWC"))
    feats = jnp.maximum(feats + conv_b, 0.0)
    pooled = jnp.mean(feats, axis=(1, 2))
    return pooled @ fc_w.T + fc_b


if __name__ == "__main__":
    key = jax.random.PRNGKey(0)
    k_x, k_cw, k_cb, k_fw, k_fb = jax.random.split(key, 5)

    N, C_in, H, W = 2, 4, 16, 16       # input (PyTorch NCHW)
    C_feat = 32                        # org_classes (feature channels)
    num_classes = 10

    x = jax.random.normal(k_x, (N, C_in, H, W), jnp.float32)
    conv_w = jax.random.normal(k_cw, (3, 3, C_in, C_feat), jnp.float32) * 0.1
    conv_b = jax.random.normal(k_cb, (C_feat,), jnp.float32) * 0.1
    fc_w = jax.random.normal(k_fw, (num_classes, C_feat), jnp.float32) * 0.1
    fc_b = jax.random.normal(k_fb, (num_classes,), jnp.float32) * 0.1

    out = new_classification_model_forward(x, conv_w, conv_b, fc_w, fc_b)
    out = jax.block_until_ready(out)

    ref = _reference(x, conv_w, conv_b, fc_w, fc_b)
    assert out.shape == (N, num_classes)
    assert jnp.allclose(out, ref, atol=1e-4, rtol=1e-4)

    print("KERNEL_OK")
</pallas_src>

<mosaic_0001>
module attributes {stable_mosaic.version = 11 : i64} {
  func.func @kernel(%arg0: i32, %arg1: memref<1x256x128xf32, #tpu.memory_space<vmem>>, %arg2: memref<128x128xf32, #tpu.memory_space<vmem>>, %arg3: memref<1x128xf32, #tpu.memory_space<vmem>>, %arg4: memref<128x128xf32, #tpu.memory_space<vmem>>, %arg5: memref<1x128xf32, #tpu.memory_space<vmem>>, %arg6: memref<1x1x128xf32, #tpu.memory_space<vmem>>) attributes {dimension_semantics = [#tpu.dimension_semantics<parallel>], iteration_bounds = array<i64: 2>, scalar_prefetch = 0 : i64, scratch_operands = 0 : i64, tpu.core_type = #tpu.core_type<tc>, window_params = [{transform_indices = @transform_0, window_bounds = array<i64: 1, 256, 128>}, {pipeline_mode = #tpu.pipeline_mode<synchronous>, transform_indices = @transform_1, window_bounds = array<i64: 128, 128>}, {pipeline_mode = #tpu.pipeline_mode<synchronous>, transform_indices = @transform_2, window_bounds = array<i64: 1, 128>}, {pipeline_mode = #tpu.pipeline_mode<synchronous>, transform_indices = @transform_3, window_bounds = array<i64: 128, 128>}, {pipeline_mode = #tpu.pipeline_mode<synchronous>, transform_indices = @transform_4, window_bounds = array<i64: 1, 128>}, {transform_indices = @transform_5, window_bounds = array<i64: 1, 1, 128>}]} {
    %c0 = arith.constant 0 : index
    %c0_0 = arith.constant 0 : index
    %c0_1 = arith.constant 0 : index
    %0 = vector.load %arg1[%c0, %c0_0, %c0_1] : memref<1x256x128xf32, #tpu.memory_space<vmem>>, vector<1x256x128xf32>
    %1 = vector.shape_cast %0 : vector<1x256x128xf32> to vector<256x128xf32>
    %c0_2 = arith.constant 0 : index
    %c0_3 = arith.constant 0 : index
    %2 = vector.load %arg2[%c0_2, %c0_3] : memref<128x128xf32, #tpu.memory_space<vmem>>, vector<128x128xf32>
    %cst = arith.constant dense<0.000000e+00> : vector<256x128xf32>
    %3 = tpu.matmul %1, %2, %cst {dimension_numbers = #tpu.dot_dimension_numbers<[1], [0], [0], [1], [0, 0, 1, 1], [], []>} : vector<256x128xf32>, vector<128x128xf32>, vector<256x128xf32> -> vector<256x128xf32>
    %c0_4 = arith.constant 0 : index
    %c0_5 = arith.constant 0 : index
    %4 = vector.load %arg3[%c0_4, %c0_5] : memref<1x128xf32, #tpu.memory_space<vmem>>, vector<1x128xf32>
    %5 = vector.broadcast %4 : vector<1x128xf32> to vector<256x128xf32>
    %6 = arith.addf %3, %5 : vector<256x128xf32>
    %cst_6 = arith.constant 0.000000e+00 : f32
    %7 = vector.broadcast %cst_6 : f32 to vector<256x128xf32>
    %8 = arith.maximumf %6, %7 : vector<256x128xf32>
    %9 = vector.shape_cast %8 : vector<256x128xf32> to vector<1x256x128xf32>
    %cst_7 = arith.constant dense<0.000000e+00> : vector<1x128xf32>
    %10 = vector.multi_reduction <add>, %9, %cst_7 [1] : vector<1x256x128xf32> to vector<1x128xf32>
    %c0_8 = arith.constant 0 : index
    %c0_9 = arith.constant 0 : index
    %11 = vector.load %arg4[%c0_8, %c0_9] : memref<128x128xf32, #tpu.memory_space<vmem>>, vector<128x128xf32>
    %cst_10 = arith.constant dense<0.000000e+00> : vector<1x128xf32>
    %12 = tpu.matmul %10, %11, %cst_10 {dimension_numbers = #tpu.dot_dimension_numbers<[1], [0], [0], [1], [0, 0, 1, 1], [], []>} : vector<1x128xf32>, vector<128x128xf32>, vector<1x128xf32> -> vector<1x128xf32>
    %c0_11 = arith.constant 0 : index
    %c0_12 = arith.constant 0 : index
    %13 = vector.load %arg5[%c0_11, %c0_12] : memref<1x128xf32, #tpu.memory_space<vmem>>, vector<1x128xf32>
    %14 = arith.addf %12, %13 : vector<1x128xf32>
    %15 = vector.shape_cast %14 : vector<1x128xf32> to vector<1x1x128xf32>
    %c0_13 = arith.constant 0 : index
    %c0_14 = arith.constant 0 : index
    %c0_15 = arith.constant 0 : index
    %16 = vector.load %arg6[%c0_13, %c0_14, %c0_15] : memref<1x1x128xf32, #tpu.memory_space<vmem>>, vector<1x1x128xf32>
    tpu.vector_store %arg6[%c0_13, %c0_14, %c0_15], %15 {strides = array<i32>} : memref<1x1x128xf32, #tpu.memory_space<vmem>>, vector<1x1x128xf32>,
    return
  }
  func.func @transform_0(%arg0: i32) -> (i32, i32, i32) {
    %c0_i32 = arith.constant 0 : i32
    %c0_i32_0 = arith.constant 0 : i32
    %c0_i32_1 = arith.constant 0 : i32
    return %arg0, %c0_i32, %c0_i32_0 : i32, i32, i32
  }
  func.func @transform_1(%arg0: i32) -> (i32, i32) {
    %c0_i32 = arith.constant 0 : i32
    %c0_i32_0 = arith.constant 0 : i32
    %c0_i32_1 = arith.constant 0 : i32
    return %c0_i32, %c0_i32_0 : i32, i32
  }
  func.func @transform_2(%arg0: i32) -> (i32, i32) {
    %c0_i32 = arith.constant 0 : i32
    %c0_i32_0 = arith.constant 0 : i32
    %c0_i32_1 = arith.constant 0 : i32
    return %c0_i32, %c0_i32_0 : i32, i32
  }
  func.func @transform_3(%arg0: i32) -> (i32, i32) {
    %c0_i32 = arith.constant 0 : i32
    %c0_i32_0 = arith.constant 0 : i32
    %c0_i32_1 = arith.constant 0 : i32
    return %c0_i32, %c0_i32_0 : i32, i32
  }
  func.func @transform_4(%arg0: i32) -> (i32, i32) {
    %c0_i32 = arith.constant 0 : i32
    %c0_i32_0 = arith.constant 0 : i32
    %c0_i32_1 = arith.constant 0 : i32
    return %c0_i32, %c0_i32_0 : i32, i32
  }
  func.func @transform_5(%arg0: i32) -> (i32, i32, i32) {
    %c0_i32 = arith.constant 0 : i32
    %c0_i32_0 = arith.constant 0 : i32
    %c0_i32_1 = arith.constant 0 : i32
    return %arg0, %c0_i32, %c0_i32_0 : i32, i32, i32
  }
}

</mosaic_0001>

<bundles_post_ra>
// kernel: tpu_custom_call.1
= control target key start
LH: loop header
LB: loop body
LE: loop exit
PB: predicated region body
PF: predicated region fallthrough
CT: control target
= control target key end

     0   :  { %10 = vsyncpa [#allocation3], 0  ;;  %s1526_s0 = inlined_call_operand.hbm [shape: f32[2,256,128], index: 0, kind: input, shape index: {}]   ;;  %s1527_s1 = inlined_call_operand.hbm [shape: f32[128,128], index: 1, kind: input, shape index: {}]   ;;  %s1528_s2 = inlined_call_operand.vmem [shape: f32[1,128], index: 2, kind: input, shape index: {}]   ;;  %s1529_s3 = inlined_call_operand.hbm [shape: f32[128,128], index: 3, kind: input, shape index: {}]   ;;  %s1530_s4 = inlined_call_operand.vmem [shape: f32[1,128], index: 4, kind: input, shape index: {}]   ;;  %s1531_s5 = inlined_call_operand.hbm [shape: f32[2,1,128], index: 5, kind: output, shape index: {}]  }
   0x1   :  { %12 = vsyncpa [#allocation3 + $0x1], 0 }
   0x2   :  { %13 = vsyncpa [#allocation6], 0 }
   0x3   :  { %14 = vsyncpa [#allocation4], 0 }
   0x4   :  { %16 = vsyncpa [#allocation4 + $0x1], 0  ;;  %s1262_s18 = smov 0   ;;  %s1264_s19 = smov 0  }
   0x5   :  { %s1266_s20 = smov 0   ;;  %s1268_s21 = smov 0  }
   0x6 LB: > { %s1283_s22 = sadd.s32 4294967295, %s1222_s21   ;;  %s806_s23 = sadd.s32 4294967294, %s1222_s21   ;;  %s1222_s21 = sphi %s1268_s21, %s1554_s21   ;;  %s1218_s20 = sphi %s1266_s20, %s1553_s20   ;;  %s1214_s19 = sphi %s1264_s19, %s1552_s19   ;;  %s1210_s18 = sphi %s1262_s18, %s1551_s18  }
   0x7   : > { %p42_p0 = scmp.ne.s32.totalorder %s1214_s19, %s1210_s18  ;;  %p1532_p1 = scmp.eq.s32.totalorder %s1283_s22, 0 }
   0x8   : > { %p150_p2 = scmp.eq.s32.totalorder %s1283_s22, 1  ;;  %p156_p3 = scmp.eq.s32.totalorder %s806_s23, 1 }
   0x9   : > { %p1292_p4 = por %p1532_p1, %p42_p0  ;;  %p807_p5 = scmp.ge.s32.totalorder %s1222_s21, 1 }
   0xa   : > { %p1297_p6 = por %p156_p3, %p42_p0  ;;  %p163_p7 = scmp.lt.s32.totalorder %s1222_s21, 3 }
   0xb   : > { %s1537_s24 = scalar_select %p1292_p4, 1, 0 }
   0xc   : > { %s1538_s25 = scalar_select %p1297_p6, 1, 0 }
   0xd   : > { %p1302_p8 = pnand %p807_p5, %p163_p7  ;;  %s1224_s27 = smov [#allocation5]  }
   0xe   : > { %s175_s28 = sshll.u32 %s1224_s27, 4  ;;  %s1225_s30 = smov [#allocation7]   ;;  %s176_s28 = int_to_ptr.vmem [resolvable:$true] %s175_s28 }
   0xf   : > { %s1539_s26 = scalar_select %p1302_p8, 1, 0 }
  0x10   : > { %p1015_p9 = pneg %p1302_p8  ;;  %s191_s6 = sshll.u32 %s1225_s30, 4  ;;  %s192_s6 = int_to_ptr.vmem [resolvable:$true] %s191_s6 }
  0x11   : > { %s1085_s7 = scalar_lea.vmem %s176_s28, 2048  ;;  %p1093_p5 = scmp.lt.s32.totalorder %s176_s28, %s176_s28 }
  0x12   : > { %p1311_p11 = pnand %p1015_p9, %p1532_p1  ;;  %p1086_p13 = scmp.ne.s32.totalorder %s176_s28, %s1085_s7 }
  0x13   : > { %p1094_p7 = scmp.lt.s32.totalorder %s1085_s7, %s1085_s7 }
  0x14   : > { %p1076_p12 = pneg %p1311_p11 }
  0x15   : > { %p1095_p10 = por %p1094_p7, %p1093_p5 }
  0x16   : > { %p1088_p0 = pnand %p1086_p13, %p1076_p12 }
  0x18   : > { %p1089_p3 = pneg %p1088_p0 }
  0x1a   : > { %p1096_p9 = pnand %p1095_p10, %p1089_p3 }
  0x1c   : > { %1099 = shalt.err (!%p1096_p9)
}
  0x1d   : > { %s1533_s8 = smov 128   ;;  %s1227_s9 = smov 8  }
  0x1e   : > { %1018 = dma.hbm_to_vmem [thread:$0]  (!%p1311_p11), %s1527_s1, 2048, %s176_s28, [#allocation6], %s1533_s8, %s1533_s8, %s1227_s9  }
  0x1f   : > { %s1111_s12 = scalar_lea.vmem %s192_s6, 2048  ;;  %p1119_p10 = scmp.lt.s32.totalorder %s192_s6, %s192_s6 }
  0x20   : > { %p1112_p13 = scmp.ne.s32.totalorder %s192_s6, %s1111_s12  ;;  %p1120_p3 = scmp.lt.s32.totalorder %s1111_s12, %s1111_s12 }
  0x22   : > { %p1114_p0 = pnand %p1112_p13, %p1076_p12  ;;  %p1121_p7 = por %p1120_p3, %p1119_p10 }
  0x24   : > { %p1115_p5 = pneg %p1114_p0 }
  0x26   : > { %p1122_p9 = pnand %p1121_p7, %p1115_p5 }
  0x28   : > { %1125 = shalt.err (!%p1122_p9)
}
  0x29   : > { %1021 = dma.hbm_to_vmem [thread:$0]  (!%p1311_p11), %s1529_s3, 2048, %s192_s6, [#allocation6], %s1533_s8, %s1533_s8, %s1227_s9  }
  0x2a   : > { %s1340_s15 = sadd.s32 1, %s1222_s21   ;;  %s29_s16 = sadd.s32 1, %s1218_s20 }
  0x2b   : > { %s26_s17 = ssub.s32 %s1222_s21, %s1340_s15  ;;  %p36_p12 = scmp.ne.s32.totalorder %s1218_s20, %s1214_s19 }
  0x2c   : > { %p27_p13 = scmp.eq.s32.totalorder %s26_s17, 0  ;;  %p37_p0 = scmp.eq.s32.totalorder %s1222_s21, 0 }
  0x2d   : > { %p1350_p5 = por %p150_p2, %p36_p12  ;;  %p1032_p10 = scmp.lt.s32.totalorder %s1222_s21, 2 }
  0x2e   : > { %s1356_s27 = scalar_select %p27_p13, %s1218_s20, %s29_s16  }
  0x2f   : > { %s1541_s23 = scalar_select %p1350_p5, 1, 0 }
  0x30   : > { %p38_p3 = por %p37_p0, %p36_p12  ;;  %s208_s28 = sand.u32 1, %s1218_s20  }
  0x31   : > { %s811_s29 = sshll.u32 %s208_s28, 8  ;;  %s822_s30 = sshll.u32 %s1222_s21, 12 }
  0x32   : > { %s1363_s10 = scalar_lea.hbm %s1526_s0, %s822_s30  ;;  %s212_s11 = scalar_lea.vmem [#allocation2], %s811_s29 }
  0x33   : > { %s219_s12 = sshll.u32 %s212_s11, 4  ;;  %p1367_p2 = pnand %p1032_p10, %p38_p3  ;;  %s1365_s12 = int_to_ptr.vmem [resolvable:$true] %s219_s12 }
  0x34   : > { %s1371_s14 = scalar_lea.sflag [#allocation3], %s208_s28  ;;  %s1126_s16 = scalar_lea.hbm %s1363_s10, 4096 }
  0x35   : > { %p1127_p11 = scmp.ne.s32.totalorder %s1363_s10, %s1126_s16  ;;  %p1128_p7 = pneg %p1367_p2 }
  0x36   : > { %s1131_s29 = scalar_lea.hbm %s1526_s0, 8192  ;;  %p1132_p13 = scmp.lt.s32.totalorder %s1363_s10, %s1526_s0 }
  0x37   : > { %p1129_p9 = pnand %p1128_p7, %p1127_p11  ;;  %p1133_p0 = scmp.lt.s32.totalorder %s1131_s29, %s1126_s16 }
  0x39   : > { %p1130_p12 = pneg %p1129_p9  ;;  %p1134_p10 = por %p1133_p0, %p1132_p13 }
  0x3b   : > { %p1135_p3 = pnand %p1134_p10, %p1130_p12 }
  0x3d   : > { %1138 = shalt.err (!%p1135_p3)
}
  0x3e   : > { %s1139_s28 = scalar_lea.vmem %s1365_s12, 4096  ;;  %s1228_s11 = smov [#allocation2]  }
  0x3f   : > { %p1140_p1 = scmp.ne.s32.totalorder %s1365_s12, %s1139_s28  ;;  %s1144_s8 = sshll.u32 %s1228_s11, 4  ;;  %s1145_s8 = int_to_ptr.vmem [resolvable:$false] %s1144_s8 }
  0x40   : > { %s1146_s17 = scalar_lea.vmem %s1145_s8, 8192  ;;  %p1147_p9 = scmp.lt.s32.totalorder %s1365_s12, %s1145_s8 }
  0x41   : > { %p1142_p6 = pnand %p1140_p1, %p1128_p7  ;;  %p1148_p5 = scmp.lt.s32.totalorder %s1146_s17, %s1139_s28 }
  0x43   : > { %p1143_p11 = pneg %p1142_p6  ;;  %p1149_p4 = por %p1148_p5, %p1147_p9 }
  0x45   : > { %p1150_p8 = pnand %p1149_p4, %p1143_p11 }
  0x47   : > { %1153 = shalt.err (!%p1150_p8)
}
  0x48   : > { %s1543_s16 = smov 128   ;;  %p1544_p1 = scmp.ne.s32.totalorder %s1539_s26, 0 }
  0x49   : > { %1025 = dma.hbm_to_vmem [thread:$0]  (!%p1367_p2), %s1363_s10, 4096, %s1365_s12, %s1371_s14, %s1543_s16, %s1543_s16, %s1227_s9  }
  0x4a   : > { %231 = sbr.rel (%p1544_p1) target bundleno = 599 (0x257), region = 40  ;;  %s1398_s30 = sand.u32 (!%p1544_p1), 1, %s1214_s19  }
  0x4b   : > { %s815_s8 = sshll.u32 (!%p1544_p1), %s1398_s30, 8  ;;  %s234_s29 = scalar_lea.sflag (!%p1544_p1), [#allocation3], %s1398_s30 }
  0x4c   : > { %s1402_s6 = scalar_lea.vmem (!%p1544_p1), [#allocation2], %s815_s8  ;;  %p1545_p4 = scmp.ne.s32.totalorder (!%p1544_p1), %s1537_s24, 0 }
  0x4f   : > { %1197 = dma.done.wait (%p1545_p4), %s234_s29, 4096  }
  0x50   : > { %1199 = vsyncadd (%p1545_p4), %s234_s29, 4294963200  ;;  %p1546_p6 = scmp.eq.s32.totalorder %s1283_s22, 0 }
  0x52   : > { %1201 = dma.done.wait (%p1546_p6), [#allocation6], 4096   ;;  %p1547_p8 = pmov %p1546_p6 }
  0x53   : > { %v318_v0 = vld [vmem:[#allocation5 + $0x78] sm:$0xff]  ;;  %v317_v1 = vld [vmem:[#allocation5 + $0x70] sm:$0xff]  ;;  %v316_v2 = vld [vmem:[#allocation5 + $0x68] sm:$0xff]  ;;  %v1229_v48 = vmov 0.0   ;;  %vm1230_vm0 = vmmov 0   ;;  %s819_s12 = sshll.u32 %s1283_s22, 4 }
  0x54   : > { %1203 = vsyncadd (%p1547_p8), [#allocation6], 4294963200  ;;  %888 = vmatprep.subr.mxu0 %v318_v0  ;;  %v315_v3 = vld [vmem:[#allocation5 + $0x60] sm:$0xff]  ;;  %v314_v5 = vld [vmem:[#allocation5 + $0x58] sm:$0xff]  ;;  %968 = vmatprep.subr.mxu1 %v1229_v48  ;;  %s270_s13 = scalar_lea.vmem [#allocation8], %s1398_s30  ;;  %s1489_s11 = scalar_lea.hbm %s1531_s5, %s819_s12 }
  0x55   : > { %889 = vmatpush3.msra.mxu0 %v318_v0  ;;  %v271_v4 = vld [vmem:[%s1402_s6] sm:$0xff]  ;;  %v313_v6 = vld [vmem:[#allocation5 + $0x50] sm:$0xff]  ;;  %v312_v7 = vld [vmem:[#allocation5 + $0x48] sm:$0xff]  ;;  %1000 = vmatprep.mubr.msk.f32.mxu1 %vm1230_vm0, %v1229_v48  ;;  %s721_s14 = sshll.u32 %s270_s13, 4  ;;  %s709_s17 = scalar_lea.sflag [#allocation4], %s1398_s30  ;;  %s722_s14 = int_to_ptr.vmem [resolvable:$true] %s721_s14 }
  0x56   : > { %890 = vmatprep.subr.mxu0 %v317_v1  ;;  %920 = vmatprep.mubr.f32.mxu0 %v271_v4  ;;  %v311_v8 = vld [vmem:[#allocation5 + $0x40] sm:$0xff]  ;;  %v310_v9 = vld [vmem:[#allocation5 + $0x38] sm:$0xff]  ;;  %v309_v10 = vld [vmem:[#allocation5 + $0x30] sm:$0xff]  ;;  %s1154_s16 = scalar_lea.vmem %s722_s14, 16  ;;  %p1548_p2 = scmp.ne.s32.totalorder %s1541_s23, 0 }
  0x57   : > { %891 = vmatpush3.msra.mxu0 %v317_v1  ;;  %v308_v11 = vld [vmem:[#allocation5 + $0x28] sm:$0xff]  ;;  %v307_v12 = vld [vmem:[#allocation5 + $0x20] sm:$0xff]  ;;  %v306_v13 = vld [vmem:[#allocation5 + $0x18] sm:$0xff]  ;;  %p1155_p5 = scmp.ne.s32.totalorder %s722_s14, %s1154_s16  ;;  %s1231_s8 = smov [#allocation8]  }
  0x58   : > { %892 = vmatprep.subr.mxu0 %v316_v2  ;;  %v305_v14 = vld [vmem:[#allocation5 + $0x10] sm:$0xff]  ;;  %v304_v15 = vld [vmem:[#allocation5 + $0x8] sm:$0xff]  ;;  %v303_v16 = vld [vmem:[#allocation5] sm:$0xff]  ;;  %s1158_s22 = sshll.u32 %s1231_s8, 4  ;;  %s1159_s22 = int_to_ptr.vmem [resolvable:$false] %s1158_s22 }
  0x59   : > { %893 = vmatpush3.msra.mxu0 %v316_v2  ;;  %v272_v17 = vld [vmem:[%s1402_s6 + $0x8] sm:$0xff]  ;;  %v273_v18 = vld [vmem:[%s1402_s6 + $0x10] sm:$0xff]  ;;  %v274_v19 = vld [vmem:[%s1402_s6 + $0x18] sm:$0xff]  ;;  %p1156_p7 = pnand %p1155_p5, %p1548_p2  ;;  %s1160_s29 = scalar_lea.vmem %s1159_s22, 32 }
  0x5a   : > { %894 = vmatprep.subr.mxu0 %v315_v3  ;;  %v275_v20 = vld [vmem:[%s1402_s6 + $0x20] sm:$0xff]  ;;  %v276_v21 = vld [vmem:[%s1402_s6 + $0x28] sm:$0xff]  ;;  %v277_v22 = vld [vmem:[%s1402_s6 + $0x30] sm:$0xff]  ;;  %p1161_p13 = scmp.lt.s32.totalorder %s722_s14, %s1159_s22  ;;  %p1162_p0 = scmp.lt.s32.totalorder %s1160_s29, %s1154_s16 }
  0x5b   : > { %895 = vmatpush3.msra.mxu0 %v315_v3  ;;  %v278_v23 = vld [vmem:[%s1402_s6 + $0x38] sm:$0xff]  ;;  %v279_v24 = vld [vmem:[%s1402_s6 + $0x40] sm:$0xff]  ;;  %v280_v25 = vld [vmem:[%s1402_s6 + $0x48] sm:$0xff]  ;;  %p1157_p12 = pneg %p1156_p7 }
  0x5c   : > { %896 = vmatprep.subr.mxu0 %v314_v5  ;;  %v281_v26 = vld [vmem:[%s1402_s6 + $0x50] sm:$0xff]  ;;  %v282_v27 = vld [vmem:[%s1402_s6 + $0x58] sm:$0xff]  ;;  %v283_v28 = vld [vmem:[%s1402_s6 + $0x60] sm:$0xff]  ;;  %p1163_p10 = por %p1162_p0, %p1161_p13 }
  0x5d   : > { %897 = vmatpush3.msra.mxu0 %v314_v5  ;;  %v284_v29 = vld [vmem:[%s1402_s6 + $0x68] sm:$0xff]  ;;  %v285_v30 = vld [vmem:[%s1402_s6 + $0x70] sm:$0xff]  ;;  %v286_v31 = vld [vmem:[%s1402_s6 + $0x78] sm:$0xff] }
  0x5e   : > { %898 = vmatprep.subr.mxu0 %v313_v6  ;;  %v287_v32 = vld [vmem:[%s1402_s6 + $0x80] sm:$0xff]  ;;  %v288_v33 = vld [vmem:[%s1402_s6 + $0x88] sm:$0xff]  ;;  %v289_v34 = vld [vmem:[%s1402_s6 + $0x90] sm:$0xff]  ;;  %p1164_p3 = pnand %p1163_p10, %p1157_p12 }
  0x5f   : > { %899 = vmatpush3.msra.mxu0 %v313_v6  ;;  %v290_v35 = vld [vmem:[%s1402_s6 + $0x98] sm:$0xff]  ;;  %v291_v36 = vld [vmem:[%s1402_s6 + $0xa0] sm:$0xff]  ;;  %v292_v37 = vld [vmem:[%s1402_s6 + $0xa8] sm:$0xff] }
  0x60   : > { %900 = vmatprep.subr.mxu0 %v312_v7  ;;  %v293_v38 = vld [vmem:[%s1402_s6 + $0xb0] sm:$0xff]  ;;  %v294_v39 = vld [vmem:[%s1402_s6 + $0xb8] sm:$0xff]  ;;  %v295_v40 = vld [vmem:[%s1402_s6 + $0xc0] sm:$0xff] }
  0x61   : > { %901 = vmatpush3.msra.mxu0 %v312_v7  ;;  %v296_v41 = vld [vmem:[%s1402_s6 + $0xc8] sm:$0xff]  ;;  %v297_v42 = vld [vmem:[%s1402_s6 + $0xd0] sm:$0xff]  ;;  %v298_v43 = vld [vmem:[%s1402_s6 + $0xd8] sm:$0xff] }
  0x62   : > { %902 = vmatprep.subr.mxu0 %v311_v8  ;;  %v299_v44 = vld [vmem:[%s1402_s6 + $0xe0] sm:$0xff]  ;;  %v300_v45 = vld [vmem:[%s1402_s6 + $0xe8] sm:$0xff]  ;;  %v301_v46 = vld [vmem:[%s1402_s6 + $0xf0] sm:$0xff] }
  0x63   : > { %903 = vmatpush3.msra.mxu0 %v311_v8  ;;  %v302_v47 = vld [vmem:[%s1402_s6 + $0xf8] sm:$0xff]  ;;  %v634_v50 = vld [vmem:[#allocation7 + $0x70] sm:$0xff]  ;;  %v633_v51 = vld [vmem:[#allocation7 + $0x68] sm:$0xff] }
  0x64   : > { %904 = vmatprep.subr.mxu0 %v310_v9  ;;  %v635_v49 = vld [vmem:[#allocation7 + $0x78] sm:$0xff]  ;;  %v632_v52 = vld [vmem:[#allocation7 + $0x60] sm:$0xff]  ;;  %v630_v54 = vld [vmem:[#allocation7 + $0x50] sm:$0xff] }
  0x65   : > { %905 = vmatpush3.msra.mxu0 %v310_v9  ;;  %969 = vmatpush3.msra.mxu1 %v635_v49  ;;  %v631_v53 = vld [vmem:[#allocation7 + $0x58] sm:$0xff]  ;;  %v629_v55 = vld [vmem:[#allocation7 + $0x48] sm:$0xff]  ;;  %v628_v56 = vld [vmem:[#allocation7 + $0x40] sm:$0xff] }
  0x66   : > { %906 = vmatprep.subr.mxu0 %v309_v10  ;;  %970 = vmatprep.subr.mxu1 %v1229_v48  ;;  %v627_v57 = vld [vmem:[#allocation7 + $0x38] sm:$0xff]  ;;  %v626_v58 = vld [vmem:[#allocation7 + $0x30] sm:$0xff]  ;;  %v625_v59 = vld [vmem:[#allocation7 + $0x28] sm:$0xff] }
  0x67   : > { %907 = vmatpush3.msra.mxu0 %v309_v10  ;;  %971 = vmatpush3.msra.mxu1 %v634_v50  ;;  %v624_v60 = vld [vmem:[#allocation7 + $0x20] sm:$0xff]  ;;  %v623_v61 = vld [vmem:[#allocation7 + $0x18] sm:$0xff]  ;;  %v622_v62 = vld [vmem:[#allocation7 + $0x10] sm:$0xff] }
  0x68   : > { %908 = vmatprep.subr.mxu0 %v308_v11  ;;  %972 = vmatprep.subr.mxu1 %v1229_v48  ;;  %v621_v63 = vld [vmem:[#allocation7 + $0x8] sm:$0xff]  ;;  %v620_v0 = vld [vmem:[#allocation7] sm:$0xff] }
  0x69   : > { %909 = vmatpush3.msra.mxu0 %v308_v11  ;;  %973 = vmatpush3.msra.mxu1 %v633_v51  ;;  %v1447_v2 = vld [vmem:[%s1528_s2] ss:$0 sm:$0xff] }
  0x6a   : > { %910 = vmatprep.subr.mxu0 %v307_v12  ;;  %974 = vmatprep.subr.mxu1 %v1229_v48 }
  0x6b   : > { %911 = vmatpush3.msra.mxu0 %v307_v12  ;;  %975 = vmatpush3.msra.mxu1 %v632_v52 }
  0x6c   : > { %912 = vmatprep.subr.mxu0 %v306_v13  ;;  %976 = vmatprep.subr.mxu1 %v1229_v48 }
  0x6d   : > { %913 = vmatpush3.msra.mxu0 %v306_v13  ;;  %977 = vmatpush3.msra.mxu1 %v631_v53 }
  0x6e   : > { %914 = vmatprep.subr.mxu0 %v305_v14  ;;  %978 = vmatprep.subr.mxu1 %v1229_v48 }
  0x6f   : > { %915 = vmatpush3.msra.mxu0 %v305_v14  ;;  %979 = vmatpush3.msra.mxu1 %v630_v54 }
  0x70   : > { %916 = vmatprep.subr.mxu0 %v304_v15  ;;  %980 = vmatprep.subr.mxu1 %v1229_v48 }
  0x71   : > { %917 = vmatpush3.msra.mxu0 %v304_v15  ;;  %981 = vmatpush3.msra.mxu1 %v629_v55 }
  0x72   : > { %918 = vmatprep.subr.mxu0 %v303_v16  ;;  %982 = vmatprep.subr.mxu1 %v1229_v48 }
  0x73   : > { %919 = vmatpush3.msra.mxu0 %v303_v16  ;;  %983 = vmatpush3.msra.mxu1 %v628_v56 }
  0x74   : > { %921 = vmatmul.mubr.f32.vlgmr.msra.gmra.mxu0 %v272_v17  ;;  %984 = vmatprep.subr.mxu1 %v1229_v48 }
  0x75   : > { %923 = vmatprep.mubr.f32.mxu0 %v273_v18  ;;  %985 = vmatpush3.msra.mxu1 %v627_v57 }
  0x76   : > { %986 = vmatprep.subr.mxu1 %v1229_v48 }
  0x77   : > { %987 = vmatpush3.msra.mxu1 %v626_v58 }
  0x78   : > { %924 = vmatmul.mubr.f32.gmra.mxu0 %v274_v19  ;;  %988 = vmatprep.subr.mxu1 %v1229_v48 }
  0x79   : > { %926 = vmatprep.mubr.f32.mxu0 %v275_v20  ;;  %989 = vmatpush3.msra.mxu1 %v625_v59 }
  0x7a   : > { %990 = vmatprep.subr.mxu1 %v1229_v48 }
  0x7b   : > { %991 = vmatpush3.msra.mxu1 %v624_v60 }
  0x7c   : > { %927 = vmatmul.mubr.f32.gmra.mxu0 %v276_v21  ;;  %992 = vmatprep.subr.mxu1 %v1229_v48 }
  0x7d   : > { %929 = vmatprep.mubr.f32.mxu0 %v277_v22  ;;  %993 = vmatpush3.msra.mxu1 %v623_v61 }
  0x7e   : > { %994 = vmatprep.subr.mxu1 %v1229_v48 }
  0x7f   : > { %995 = vmatpush3.msra.mxu1 %v622_v62 }
  0x80   : > { %930 = vmatmul.mubr.f32.gmra.mxu0 %v278_v23  ;;  %996 = vmatprep.subr.mxu1 %v1229_v48 }
  0x81   : > { %932 = vmatprep.mubr.f32.mxu0 %v279_v24  ;;  %997 = vmatpush3.msra.mxu1 %v621_v63 }
  0x82   : > { %998 = vmatprep.subr.mxu1 %v1229_v48 }
  0x83   : > { %999 = vmatpush3.msra.mxu1 %v620_v0 }
  0x84   : > { %933 = vmatmul.mubr.f32.gmra.mxu0 %v280_v25 }
  0x85   : > { %935 = vmatprep.mubr.f32.mxu0 %v281_v26 }
  0x88   : > { %936 = vmatmul.mubr.f32.gmra.mxu0 %v282_v27 }
  0x89   : > { %938 = vmatprep.mubr.f32.mxu0 %v283_v28 }
  0x8c   : > { %939 = vmatmul.mubr.f32.gmra.mxu0 %v284_v29 }
  0x8d   : > { %941 = vmatprep.mubr.f32.mxu0 %v285_v30 }
  0x90   : > { %942 = vmatmul.mubr.f32.gmra.mxu0 %v286_v31 }
  0x91   : > { %944 = vmatprep.mubr.f32.mxu0 %v287_v32 }
  0x94   : > { %945 = vmatmul.mubr.f32.gmra.mxu0 %v288_v33 }
  0x95   : > { %947 = vmatprep.mubr.f32.mxu0 %v289_v34 }
  0x98   : > { %948 = vmatmul.mubr.f32.gmra.mxu0 %v290_v35 }
  0x99   : > { %950 = vmatprep.mubr.f32.mxu0 %v291_v36 }
  0x9c   : > { %951 = vmatmul.mubr.f32.gmra.mxu0 %v292_v37 }
  0x9d   : > { %953 = vmatprep.mubr.f32.mxu0 %v293_v38 }
  0xa0   : > { %954 = vmatmul.mubr.f32.gmra.mxu0 %v294_v39 }
  0xa1   : > { %956 = vmatprep.mubr.f32.mxu0 %v295_v40 }
  0xa4   : > { %957 = vmatmul.mubr.f32.gmra.mxu0 %v296_v41 }
  0xa5   : > { %959 = vmatprep.mubr.f32.mxu0 %v297_v42 }
  0xa8   : > { %960 = vmatmul.mubr.f32.gmra.mxu0 %v298_v43 }
  0xa9   : > { %962 = vmatprep.mubr.f32.mxu0 %v299_v44 }
  0xac   : > { %963 = vmatmul.mubr.f32.gmra.mxu0 %v300_v45 }
  0xad   : > { %965 = vmatprep.mubr.f32.mxu0 %v301_v46 }
  0xb0   : > { %966 = vmatmul.mubr.f32.gmra.mxu0 %v302_v47 }
 0x134   : > { %v922_v1 = vpop.f32.mrf.mxu0 }
 0x135   : > { %v398_v4 = vadd.f32 %v922_v1, %v1447_v2 }
 0x136   : > { %v392_v3 = vpop.f32.mrf.mxu0 }
 0x137   : > { %v393_v5 = vadd.f32 %v1447_v2, %v392_v3  ;;  %v552_v9 = vmax.f32 %v398_v4, 0.0 }
 0x138   : > { %v925_v6 = vpop.f32.mrf.mxu0 }
 0x139   : > { %v551_v7 = vmax.f32 %v393_v5, 0.0  ;;  %v408_v10 = vadd.f32 %v925_v6, %v1447_v2 }
 0x13a   : > { %v402_v8 = vpop.f32.mrf.mxu0 }
 0x13b   : > { %v403_v11 = vadd.f32 %v1447_v2, %v402_v8  ;;  %v583_v13 = vadd.f32 %v552_v9, %v551_v7  ;;  %v554_v16 = vmax.f32 %v408_v10, 0.0 }
 0x13c   : > { %v928_v12 = vpop.f32.mrf.mxu0 }
 0x13d   : > { %v553_v14 = vmax.f32 %v403_v11, 0.0  ;;  %v418_v18 = vadd.f32 %v928_v12, %v1447_v2 }
 0x13e   : > { %v412_v15 = vpop.f32.mrf.mxu0 }
 0x13f   : > { %v584_v17 = vadd.f32 %v583_v13, %v553_v14  ;;  %v413_v19 = vadd.f32 %v1447_v2, %v412_v15  ;;  %v556_v24 = vmax.f32 %v418_v18, 0.0 }
 0x140   : > { %v931_v20 = vpop.f32.mrf.mxu0 }
 0x141   : > { %v555_v21 = vmax.f32 %v413_v19, 0.0  ;;  %v585_v22 = vadd.f32 %v584_v17, %v554_v16  ;;  %v428_v26 = vadd.f32 %v931_v20, %v1447_v2 }
 0x142   : > { %v422_v23 = vpop.f32.mrf.mxu0 }
 0x143   : > { %v586_v25 = vadd.f32 %v585_v22, %v555_v21  ;;  %v423_v27 = vadd.f32 %v1447_v2, %v422_v23  ;;  %v558_v32 = vmax.f32 %v428_v26, 0.0 }
 0x144   : > { %v934_v28 = vpop.f32.mrf.mxu0 }
 0x145   : > { %v557_v29 = vmax.f32 %v423_v27, 0.0  ;;  %v587_v30 = vadd.f32 %v586_v25, %v556_v24  ;;  %v438_v34 = vadd.f32 %v934_v28, %v1447_v2 }
 0x146   : > { %v432_v31 = vpop.f32.mrf.mxu0 }
 0x147   : > { %v588_v33 = vadd.f32 %v587_v30, %v557_v29  ;;  %v433_v35 = vadd.f32 %v1447_v2, %v432_v31  ;;  %v560_v40 = vmax.f32 %v438_v34, 0.0 }
 0x148   : > { %v937_v36 = vpop.f32.mrf.mxu0 }
 0x149   : > { %v559_v37 = vmax.f32 %v433_v35, 0.0  ;;  %v589_v38 = vadd.f32 %v588_v33, %v558_v32  ;;  %v448_v42 = vadd.f32 %v937_v36, %v1447_v2 }
 0x14a   : > { %v442_v39 = vpop.f32.mrf.mxu0 }
 0x14b   : > { %v590_v41 = vadd.f32 %v589_v38, %v559_v37  ;;  %v443_v43 = vadd.f32 %v1447_v2, %v442_v39  ;;  %v562_v48 = vmax.f32 %v448_v42, 0.0 }
 0x14c   : > { %v940_v44 = vpop.f32.mrf.mxu0 }
 0x14d   : > { %v561_v45 = vmax.f32 %v443_v43, 0.0  ;;  %v591_v46 = vadd.f32 %v590_v41, %v560_v40  ;;  %v458_v50 = vadd.f32 %v940_v44, %v1447_v2 }
 0x14e   : > { %v452_v47 = vpop.f32.mrf.mxu0 }
 0x14f   : > { %v592_v49 = vadd.f32 %v591_v46, %v561_v45  ;;  %v453_v51 = vadd.f32 %v1447_v2, %v452_v47  ;;  %v564_v56 = vmax.f32 %v458_v50, 0.0 }
 0x150   : > { %v943_v52 = vpop.f32.mrf.mxu0 }
 0x151   : > { %v563_v53 = vmax.f32 %v453_v51, 0.0  ;;  %v593_v54 = vadd.f32 %v592_v49, %v562_v48  ;;  %v468_v58 = vadd.f32 %v943_v52, %v1447_v2 }
 0x152   : > { %v462_v55 = vpop.f32.mrf.mxu0 }
 0x153   : > { %v594_v57 = vadd.f32 %v593_v54, %v563_v53  ;;  %v463_v59 = vadd.f32 %v1447_v2, %v462_v55  ;;  %v566_v0 = vmax.f32 %v468_v58, 0.0 }
 0x154   : > { %v946_v60 = vpop.f32.mrf.mxu0 }
 0x155   : > { %v565_v61 = vmax.f32 %v463_v59, 0.0  ;;  %v595_v62 = vadd.f32 %v594_v57, %v564_v56  ;;  %v478_v3 = vadd.f32 %v946_v60, %v1447_v2 }
 0x156   : > { %v472_v63 = vpop.f32.mrf.mxu0 }
 0x157   : > { %v596_v1 = vadd.f32 %v595_v62, %v565_v61  ;;  %v473_v4 = vadd.f32 %v1447_v2, %v472_v63  ;;  %v568_v9 = vmax.f32 %v478_v3, 0.0 }
 0x158   : > { %v949_v5 = vpop.f32.mrf.mxu0 }
 0x159   : > { %v567_v6 = vmax.f32 %v473_v4, 0.0  ;;  %v597_v7 = vadd.f32 %v596_v1, %v566_v0  ;;  %v488_v11 = vadd.f32 %v949_v5, %v1447_v2 }
 0x15a   : > { %v482_v8 = vpop.f32.mrf.mxu0 }
 0x15b   : > { %v598_v10 = vadd.f32 %v597_v7, %v567_v6  ;;  %v483_v12 = vadd.f32 %v1447_v2, %v482_v8  ;;  %v570_v17 = vmax.f32 %v488_v11, 0.0 }
 0x15c   : > { %v952_v13 = vpop.f32.mrf.mxu0 }
 0x15d   : > { %v569_v14 = vmax.f32 %v483_v12, 0.0  ;;  %v599_v15 = vadd.f32 %v598_v10, %v568_v9  ;;  %v498_v19 = vadd.f32 %v952_v13, %v1447_v2  ;;  %v636_v9 = vld [vmem:[%s1530_s4] sm:$0x1] }
 0x15e   : > { %v492_v16 = vpop.f32.mrf.mxu0 }
 0x15f   : > { %v600_v18 = vadd.f32 %v599_v15, %v569_v14  ;;  %v493_v20 = vadd.f32 %v1447_v2, %v492_v16  ;;  %v572_v25 = vmax.f32 %v498_v19, 0.0 }
 0x160   : > { %v955_v21 = vpop.f32.mrf.mxu0 }
 0x161   : > { %v571_v22 = vmax.f32 %v493_v20, 0.0  ;;  %v601_v23 = vadd.f32 %v600_v18, %v570_v17  ;;  %v508_v27 = vadd.f32 %v955_v21, %v1447_v2 }
 0x162   : > { %v502_v24 = vpop.f32.mrf.mxu0 }
 0x163   : > { %v602_v26 = vadd.f32 %v601_v23, %v571_v22  ;;  %v503_v28 = vadd.f32 %v1447_v2, %v502_v24  ;;  %v574_v33 = vmax.f32 %v508_v27, 0.0 }
 0x164   : > { %v958_v29 = vpop.f32.mrf.mxu0 }
 0x165   : > { %v573_v30 = vmax.f32 %v503_v28, 0.0  ;;  %v603_v31 = vadd.f32 %v602_v26, %v572_v25  ;;  %v518_v35 = vadd.f32 %v958_v29, %v1447_v2 }
 0x166   : > { %v512_v32 = vpop.f32.mrf.mxu0 }
 0x167   : > { %v604_v34 = vadd.f32 %v603_v31, %v573_v30  ;;  %v513_v36 = vadd.f32 %v1447_v2, %v512_v32  ;;  %v576_v41 = vmax.f32 %v518_v35, 0.0 }
 0x168   : > { %v961_v37 = vpop.f32.mrf.mxu0 }
 0x169   : > { %v575_v38 = vmax.f32 %v513_v36, 0.0  ;;  %v605_v39 = vadd.f32 %v604_v34, %v574_v33  ;;  %v528_v43 = vadd.f32 %v961_v37, %v1447_v2 }
 0x16a   : > { %v522_v40 = vpop.f32.mrf.mxu0 }
 0x16b   : > { %v606_v42 = vadd.f32 %v605_v39, %v575_v38  ;;  %v523_v44 = vadd.f32 %v1447_v2, %v522_v40  ;;  %v578_v49 = vmax.f32 %v528_v43, 0.0 }
 0x16c   : > { %v964_v45 = vpop.f32.mrf.mxu0 }
 0x16d   : > { %v577_v46 = vmax.f32 %v523_v44, 0.0  ;;  %v607_v47 = vadd.f32 %v606_v42, %v576_v41  ;;  %v538_v51 = vadd.f32 %v964_v45, %v1447_v2 }
 0x16e   : > { %v532_v48 = vpop.f32.mrf.mxu0 }
 0x16f   : > { %v608_v50 = vadd.f32 %v607_v47, %v577_v46  ;;  %v533_v52 = vadd.f32 %v1447_v2, %v532_v48  ;;  %v580_v57 = vmax.f32 %v538_v51, 0.0 }
 0x170   : > { %v967_v53 = vpop.f32.mrf.mxu0 }
 0x171   : > { %v579_v54 = vmax.f32 %v533_v52, 0.0  ;;  %v609_v55 = vadd.f32 %v608_v50, %v578_v49  ;;  %v548_v59 = vadd.f32 %v967_v53, %v1447_v2 }
 0x172   : > { %v542_v56 = vpop.f32.mrf.mxu0 }
 0x173   : > { %v610_v58 = vadd.f32 %v609_v55, %v579_v54  ;;  %v543_v60 = vadd.f32 %v1447_v2, %v542_v56  ;;  %v582_v63 = vmax.f32 %v548_v59, 0.0 }
 0x175   : > { %v581_v61 = vmax.f32 %v543_v60, 0.0  ;;  %v611_v62 = vadd.f32 %v610_v58, %v580_v57 }
 0x177   : > { %v612_v0 = vadd.f32 %v611_v62, %v581_v61 }
 0x179   : > { %v613_v1 = vadd.f32 %v612_v0, %v582_v63 }
 0x17b   : > { %v614_v3 = vrot.slane %v613_v1, 4 }
 0x17d   : > { %v615_v4 = vadd.f32 %v614_v3, %v613_v1 }
 0x17f   : > { %v616_v5 = vrot.slane %v615_v4, 2 }
 0x181   : > { %v617_v6 = vadd.f32 %v616_v5, %v615_v4 }
 0x183   : > { %v618_v7 = vrot.slane %v617_v6, 1 }
 0x185   : > { %v619_v8 = vadd.f32 %v618_v7, %v617_v6 }
 0x187   : > { %1001 = vmatmul.mubr.f32.vlgmr.msra.gmra.mxu1 %v619_v8 }
 0x247   : > { %v703_v2 = vpop.f32.mrf.mxu1 }
 0x248   : > { %v704_v10 = vadd.f32 %v703_v2, %v636_v9 }
 0x249   : > { %v1002_v11 = vpop.f32.mrf.mxu1 }
 0x24a   : > { %707 = vst [vmem:[%s270_s13] sm:$0x1] %v704_v10 }
 0x24b   : > { %1167 = shalt.err (!%p1164_p3)
}
 0x24c   : > { %s1168_s6 = scalar_lea.hbm %s1489_s11, 16  ;;  %s1172_s26 = scalar_lea.hbm %s1531_s5, 32 }
 0x24d   : > { %p1169_p11 = scmp.ne.s32.totalorder %s1489_s11, %s1168_s6  ;;  %p1173_p4 = scmp.lt.s32.totalorder %s1489_s11, %s1531_s5 }
 0x24e   : > { %p1174_p6 = scmp.lt.s32.totalorder %s1172_s26, %s1168_s6 }
 0x24f   : > { %p1170_p9 = pnand %p1169_p11, %p1548_p2 }
 0x250   : > { %p1175_p8 = por %p1174_p6, %p1173_p4 }
 0x251   : > { %p1171_p1 = pneg %p1170_p9 }
 0x253   : > { %p1176_p5 = pnand %p1175_p8, %p1171_p1 }
 0x255   : > { %1179 = shalt.err (!%p1176_p5)
}
 0x256   : > { %1013 = dma.vmem_to_hbm [thread:$0]  (%p1548_p2), %s722_s14, 16, %s1489_s11, %s709_s17  }
 0x257 PF: > { %s733_s12 = sand.u32 1, %s1210_s18   ;;  %p1549_p7 = scmp.ne.s32.totalorder %s1538_s25, 0 }
 0x258   : > { %p1550_p12 = scmp.ge.s32.totalorder %s1222_s21, 2  ;;  %s734_s13 = scalar_lea.sflag [#allocation4], %s733_s12 }
 0x25a   : > { %p1027_p13 = pnand %p1550_p12, %p1549_p7 }
 0x25c   : > { %p1028_p0 = pneg %p1027_p13 }
 0x25e   : > { %1205 = dma.done.wait (%p1028_p0), %s734_s13, 16  }
 0x25f   : > { %1207 = vsyncadd (%p1028_p0), %s734_s13, 4294967280  ;;  %p19_p10 = scmp.ge.s32.totalorder %s1340_s15, 4   ;;  %s1551_s18 = smov %s1214_s19 }
 0x260   : > { %s1552_s19 = smov %s1218_s20  ;;  %s1553_s20 = smov %s1356_s27 }
 0x261   : > { %s1554_s21 = smov %s1340_s15  ;;  %21 = sbr.rel (!%p19_p10) target bundleno = 6 (0x6), region = 93 }
 0x266   :  { %738 = vsyncpa [#allocation3], 1 }
 0x267   :  { %740 = vsyncpa [#allocation3 + $0x1], 1 }
 0x268   :  { %741 = vsyncpa [#allocation6], 1 }
 0x269   :  { %742 = vsyncpa [#allocation4], 1 }
 0x26a   :  { %744 = vsyncpa [#allocation4 + $0x1], 1 }

</bundles_post_ra>
